<compile_context>
chip_gen: v7x
topology: tpu7x:2x2x1
jax: 0.10.0
libtpu: 0.0.40
codegen_flags: <defaults>
</compile_context>

<pallas_src>
import jax
import jax.numpy as jnp
from jax.experimental import pallas as pl
from jax.experimental.pallas import tpu as pltpu

_LANE_CANDIDATES = (2048, 1024, 512, 256, 128)  # any multiple of 128 -> unmasked vst
_TARGET_TILE_BYTES = 2 << 20                    # ~2 MiB per block
_MIN_PALLAS_BYTES = 1 << 20                     # below ~1 MiB: plain jnp fast path


def _scale_kernel(scale_ref, x_ref, o_ref):
    # scale_ref: SMEM (1,) float32 scalar; x_ref / o_ref: VMEM tiles.
    # Multiply in the tile's native dtype (frees vregs/VALU width on v6e/v7x).
    s = scale_ref[0].astype(x_ref.dtype)
    o_ref[...] = x_ref[...] * s


def scale_forward(x: jax.Array, scale, *, donate_input: bool = False,
                  force_pallas: bool = False) -> jax.Array:
    """Elementwise multiply of tensor `x` by scalar parameter `scale`."""
    orig_shape = x.shape
    n = x.size
    itemsize = jnp.dtype(x.dtype).itemsize
    nbytes = n * itemsize

    # Largest lane width (multiple of 128) that divides n exactly -> the
    # (rows, lanes) view is a free reshape, no padding / extra HBM passes.
    lanes = next((l for l in _LANE_CANDIDATES if n % l == 0), None)

    # Fast path: tiny tensors (pure launch overhead) or shapes with no clean
    # lane-dense factorisation (a pad+slice would add whole HBM passes; plain
    # XLA handles these at roofline and can fuse into neighbouring ops).
    if lanes is None or (nbytes < _MIN_PALLAS_BYTES and not force_pallas):
        return x * jnp.asarray(scale, dtype=x.dtype)

    rows = n // lanes

    # ~2 MiB row tile, multiple of 8 sublanes; clamp to the full extent.
    tile_r = max(8, (_TARGET_TILE_BYTES // (lanes * itemsize)) // 8 * 8)
    if tile_r >= rows:
        tile_r = rows  # single block == full array dims (always legal)

    x2d = x.reshape(rows, lanes)  # free layout plumbing (contiguous)
    scale_smem = jnp.asarray(scale, dtype=jnp.float32).reshape((1,))

    grid = (pl.cdiv(rows, tile_r),)  # ragged last block is masked by Pallas

    out2d = pl.pallas_call(
        _scale_kernel,
        out_shape=jax.ShapeDtypeStruct((rows, lanes), x.dtype),
        grid_spec=pl.GridSpec(
            grid=grid,
            in_specs=[
                pl.BlockSpec(memory_space=pltpu.MemorySpace.SMEM),  # scalar scale
                pl.BlockSpec((tile_r, lanes), lambda i: (i, 0)),    # pipelined tile
            ],
            out_specs=pl.BlockSpec((tile_r, lanes), lambda i: (i, 0)),
        ),
        compiler_params=pltpu.CompilerParams(
            dimension_semantics=("parallel",),
        ),
        cost_estimate=pl.CostEstimate(
            flops=n, transcendentals=0, bytes_accessed=2 * nbytes
        ),
        # Footprint-only optimization: reuses the buffer when the caller donates
        # x; HBM traffic is unchanged (every tile is still DMA'd in and out).
        input_output_aliases=({1: 0} if donate_input else {}),
    )(scale_smem, x2d)

    return out2d.reshape(orig_shape)


class Scale:
    """JAX mirror of the PyTorch Scale module."""

    def __init__(self, init_value: float = 1.0):
        # Matches torch.nn.Parameter(torch.FloatTensor([init_value]))
        self.scale = jnp.asarray([init_value], dtype=jnp.float32)

    def __call__(self, x: jax.Array) -> jax.Array:
        return scale_forward(x, self.scale[0])


if __name__ == "__main__":
    key = jax.random.PRNGKey(0)
    k1, k2, k3, k4 = jax.random.split(key, 4)

    module = Scale(init_value=1.5)

    # Canonical small NCHW input (2,4,16,16): fast path AND forced kernel path.
    x = jax.random.normal(k1, (2, 4, 16, 16), dtype=jnp.float32)
    ref = x * jnp.float32(1.5)
    out_fast = jax.block_until_ready(module(x))
    out_kern = jax.block_until_ready(
        scale_forward(x, module.scale[0], force_pallas=True))
    assert out_fast.shape == x.shape and out_fast.dtype == x.dtype
    assert out_kern.shape == x.shape and out_kern.dtype == x.dtype
    assert jnp.allclose(out_fast, ref, atol=1e-6, rtol=1e-6)
    assert jnp.allclose(out_kern, ref, atol=1e-6, rtol=1e-6)

    # Larger f32 feature map (2 MiB): takes the Pallas kernel path naturally.
    xb = jax.random.normal(k2, (2, 32, 64, 64), dtype=jnp.float32)
    outb = jax.block_until_ready(module(xb))
    assert jnp.allclose(outb, xb * jnp.float32(1.5), atol=1e-6, rtol=1e-6)

    # Odd shape (element count not a multiple of 128): jnp fast path, no pad.
    xo = jax.random.normal(k3, (3, 5, 7, 11), dtype=jnp.float32)
    outo = jax.block_until_ready(module(xo))
    assert outo.shape == xo.shape
    assert jnp.allclose(outo, xo * jnp.float32(1.5), atol=1e-6, rtol=1e-6)

    # bf16 input through the kernel (native-dtype multiply, dtype preserved).
    xh = jax.random.normal(k4, (2, 64, 64, 64), dtype=jnp.bfloat16)
    outh = jax.block_until_ready(module(xh))
    refh = xh * jnp.asarray(1.5, dtype=jnp.bfloat16)
    assert outh.dtype == jnp.bfloat16
    assert jnp.allclose(outh.astype(jnp.float32), refh.astype(jnp.float32),
                        atol=1e-2, rtol=1e-2)

    print("KERNEL_OK")
</pallas_src>

<mosaic_0001>
module attributes {stable_mosaic.version = 11 : i64} {
  func.func @_scale_kernel(%arg0: i32, %arg1: memref<1xf32, #tpu.memory_space<smem>>, %arg2: memref<1x2048xf32, #tpu.memory_space<vmem>>, %arg3: memref<1x2048xf32, #tpu.memory_space<vmem>>) attributes {dimension_semantics = [#tpu.dimension_semantics<parallel>], iteration_bounds = array<i64: 1>, scalar_prefetch = 0 : i64, scratch_operands = 0 : i64, tpu.core_type = #tpu.core_type<tc>, window_params = [{transform_indices = @transform_0, window_bounds = array<i64: 1>}, {transform_indices = @transform_1, window_bounds = array<i64: 1, 2048>}, {transform_indices = @transform_2, window_bounds = array<i64: 1, 2048>}]} {
    %c0 = arith.constant 0 : index
    %0 = memref.load %arg1[%c0] : memref<1xf32, #tpu.memory_space<smem>>
    %c0_0 = arith.constant 0 : index
    %c0_1 = arith.constant 0 : index
    %1 = vector.load %arg2[%c0_0, %c0_1] : memref<1x2048xf32, #tpu.memory_space<vmem>>, vector<1x2048xf32>
    %2 = vector.broadcast %0 : f32 to vector<1x2048xf32>
    %3 = arith.mulf %1, %2 : vector<1x2048xf32>
    %c0_2 = arith.constant 0 : index
    %c0_3 = arith.constant 0 : index
    %4 = vector.load %arg3[%c0_2, %c0_3] : memref<1x2048xf32, #tpu.memory_space<vmem>>, vector<1x2048xf32>
    tpu.vector_store %arg3[%c0_2, %c0_3], %3 {strides = array<i32>} : memref<1x2048xf32, #tpu.memory_space<vmem>>, vector<1x2048xf32>,
    return
  }
  func.func @transform_0(%arg0: i32) -> i32 {
    %c0_i32 = arith.constant 0 : i32
    %c0_i32_0 = arith.constant 0 : i32
    return %c0_i32 : i32
  }
  func.func @transform_1(%arg0: i32) -> (i32, i32) {
    %c0_i32 = arith.constant 0 : i32
    %c0_i32_0 = arith.constant 0 : i32
    return %arg0, %c0_i32 : i32, i32
  }
  func.func @transform_2(%arg0: i32) -> (i32, i32) {
    %c0_i32 = arith.constant 0 : i32
    %c0_i32_0 = arith.constant 0 : i32
    return %arg0, %c0_i32 : i32, i32
  }
}

</mosaic_0001>

<bundles_post_ra>
// kernel: tpu_custom_call.1
= control target key start
LH: loop header
LB: loop body
LE: loop exit
PB: predicated region body
PF: predicated region fallthrough
CT: control target
= control target key end

     0   :  { %8 = vsyncpa [#allocation4], 0  ;;  %s142_s0 = inlined_call_operand.<no memory space> [shape: f32[1], index: 0, kind: input, shape index: {}]   ;;  %s143_s1 = inlined_call_operand.hbm [shape: f32[1,2048], index: 1, kind: input, shape index: {}]   ;;  %s144_s2 = inlined_call_operand.hbm [shape: f32[1,2048], index: 2, kind: output, shape index: {}]  }
   0x1   :  { %9 = vsyncpa [#allocation5], 0  ;;  %s98_s9 = smov [#allocation3]   ;;  %s50_s13 = scalar_lea.hbm %s143_s1, 256 }
   0x2   :  { %s18_s10 = sshll.u32 %s98_s9, 4  ;;  %p51_p0 = scmp.ne.s32.totalorder %s143_s1, %s50_s13  ;;  %s19_s10 = int_to_ptr.vmem [resolvable:$true] %s18_s10 }
   0x3   :  { %p54_p1 = scmp.lt.u32.totalorder %s50_s13, %s143_s1 }
   0x5   :  { %p56_p2 = pnand %p54_p1, %p51_p0 }
   0x7   :  { %59 = shalt.err (!%p56_p2)
}
   0x8   :  { %s60_s18 = scalar_lea.vmem %s19_s10, 256  ;;  %p65_p4 = scmp.lt.s32.totalorder %s19_s10, %s19_s10 }
   0x9   :  { %p61_p3 = scmp.ne.s32.totalorder %s19_s10, %s60_s18  ;;  %p66_p5 = scmp.lt.s32.totalorder %s60_s18, %s60_s18 }
   0xb   :  { %p67_p6 = por %p66_p5, %p65_p4 }
   0xd   :  { %p68_p7 = pnand %p67_p6, %p61_p3 }
   0xf   :  { %71 = shalt.err (!%p68_p7)
}
  0x10   :  { %21 = dma.hbm_to_vmem [thread:$0]  %s143_s1, 256, %s19_s10, [#allocation4]  }
  0x11   :  { %94 = dma.done.wait [#allocation4], 256  }
  0x12   :  { %95 = vsyncadd [#allocation4], 4294967040  ;;  %v28_v0 = vstv %s142_s0  ;;  %s99_s23 = smov [#allocation6]   ;;  %v26_v1 = vld [vmem:[#allocation3] sm:$0xff]  ;;  %v27_v2 = vld [vmem:[#allocation3 + $0x8] sm:$0xff] }
  0x13   :  { %s39_s24 = sshll.u32 %s99_s23, 4  ;;  %v29_v3 = vmul.f32 %v28_v0, %v26_v1  ;;  %v30_v4 = vmul.f32 %v28_v0, %v27_v2  ;;  %s40_s24 = int_to_ptr.vmem [resolvable:$true] %s39_s24 }
  0x14   :  { %s72_s25 = scalar_lea.vmem %s40_s24, 256  ;;  %p77_p9 = scmp.lt.s32.totalorder %s40_s24, %s40_s24 }
  0x15   :  { %31 = vst [vmem:[#allocation6] sm:$0xff] %v29_v3  ;;  %32 = vst [vmem:[#allocation6 + $0x8] sm:$0xff] %v30_v4  ;;  %p73_p8 = scmp.ne.s32.totalorder %s40_s24, %s72_s25  ;;  %p78_p10 = scmp.lt.s32.totalorder %s72_s25, %s72_s25 }
  0x17   :  { %p79_p11 = por %p78_p10, %p77_p9 }
  0x19   :  { %p80_p12 = pnand %p79_p11, %p73_p8 }
  0x1b   :  { %83 = shalt.err (!%p80_p12)
}
  0x1c   :  { %s84_s0 = scalar_lea.hbm %s144_s2, 256 }
  0x1d   :  { %p85_p13 = scmp.ne.s32.totalorder %s144_s2, %s84_s0  ;;  %p88_p0 = scmp.lt.u32.totalorder %s84_s0, %s144_s2 }
  0x1f   :  { %p90_p1 = pnand %p88_p0, %p85_p13 }
  0x21   :  { %93 = shalt.err (!%p90_p1)
}
  0x22   :  { %42 = dma.vmem_to_hbm [thread:$0]  %s40_s24, 256, %s144_s2, [#allocation5]  }
  0x23   :  { %96 = dma.done.wait [#allocation5], 256  }
  0x24   :  { %97 = vsyncadd [#allocation5], 4294967040 }
  0x25   :  { %46 = vsyncpa [#allocation4], 1 }
  0x26   :  { %47 = vsyncpa [#allocation5], 1 }

</bundles_post_ra>
